<compile_context>
chip_gen: v6e
topology: v6e:2x2x1
jax: 0.10.0
libtpu: 0.0.40
codegen_flags: <defaults>
</compile_context>

<pallas_src>
import functools

import jax
import jax.numpy as jnp
from jax.experimental import pallas as pl
from jax.experimental.pallas import tpu as pltpu

_LANE = 128
_VMEM_LIMIT = 32 * 1024 * 1024  # safe on v5e / v6e / v7x


def _round_up(x, m):
    return (x + m - 1) // m * m


def _pick_padding_and_tile(N):
    """Pad N to a lane multiple; pick the largest tile in {1024,512,256,128}
    dividing the padded size while keeping adj padding waste < ~10% (bytes)."""
    np128 = _round_up(max(N, _LANE), _LANE)
    for t in (1024, 512, 256):
        np_t = _round_up(N, t)
        if np_t * np_t <= 1.1 * np128 * np128:
            return np_t, t
    return np128, _LANE


# --------------------------------------------------------------------------
# Fused kernel (small graphs): everything VMEM-resident, one launch.
# --------------------------------------------------------------------------
def _fused_kernel(x_ref, adj_ref, w1_ref, b1_ref, w2_ref, b2_ref, out_ref, *,
                  n_class):
    adj = adj_ref[...]
    s1 = jnp.dot(x_ref[...], w1_ref[...], preferred_element_type=jnp.float32)
    h1 = jnp.dot(adj, s1.astype(adj.dtype),
                 preferred_element_type=jnp.float32) + b1_ref[...]
    s2 = jnp.dot(h1.astype(w2_ref.dtype), w2_ref[...],
                 preferred_element_type=jnp.float32)
    h2 = jnp.dot(adj, s2.astype(adj.dtype),
                 preferred_element_type=jnp.float32) + b2_ref[...]
    # Mask padded class lanes; keep the softmax math in f32.
    col = jax.lax.broadcasted_iota(jnp.int32, h2.shape, 1)
    h2 = jnp.where(col < n_class, h2, -1e30)
    m = jnp.max(h2, axis=1, keepdims=True)
    z = h2 - m
    lse = jnp.log(jnp.sum(jnp.exp(z), axis=1, keepdims=True))
    out_ref[...] = z - lse


# --------------------------------------------------------------------------
# Kernel A (large graphs): s1 = x @ W1, tiled over rows.
# --------------------------------------------------------------------------
def _xw_kernel(x_ref, w_ref, out_ref):
    out_ref[...] = jnp.dot(
        x_ref[...], w_ref[...], preferred_element_type=jnp.float32
    ).astype(out_ref.dtype)


# --------------------------------------------------------------------------
# Kernel B (large graphs): s2 = (adj @ s1 + b1) @ W2, grid (rows, k).
# s1 is fully VMEM-resident; the k-th slab is sliced in-kernel.
# --------------------------------------------------------------------------
def _agg_linear_kernel(adj_ref, s1_ref, w2_ref, b1_ref, out_ref, acc_ref, *, tk):
    k = pl.program_id(1)

    @pl.when(k == 0)
    def _():
        acc_ref[...] = jnp.zeros_like(acc_ref)

    ks = pl.multiple_of(k * tk, tk)
    acc_ref[...] += jnp.dot(adj_ref[...], s1_ref[pl.ds(ks, tk), :],
                            preferred_element_type=jnp.float32)

    @pl.when(k == pl.num_programs(1) - 1)
    def _():
        h1 = acc_ref[...] + b1_ref[...]          # bias added once, in finalize
        out_ref[...] = jnp.dot(
            h1.astype(w2_ref.dtype), w2_ref[...],
            preferred_element_type=jnp.float32,
        ).astype(out_ref.dtype)


# --------------------------------------------------------------------------
# Kernel C (large graphs): log_softmax(adj @ s2 + b2, axis=1), grid (rows, k).
# s2 is fully VMEM-resident; the k-th slab is sliced in-kernel.
# --------------------------------------------------------------------------
def _agg_logsoftmax_kernel(adj_ref, s2_ref, b2_ref, out_ref, acc_ref, *,
                           tk, n_class):
    k = pl.program_id(1)

    @pl.when(k == 0)
    def _():
        acc_ref[...] = jnp.zeros_like(acc_ref)

    ks = pl.multiple_of(k * tk, tk)
    acc_ref[...] += jnp.dot(adj_ref[...], s2_ref[pl.ds(ks, tk), :],
                            preferred_element_type=jnp.float32)

    @pl.when(k == pl.num_programs(1) - 1)
    def _():
        h2 = acc_ref[...] + b2_ref[...]
        col = jax.lax.broadcasted_iota(jnp.int32, h2.shape, 1)
        h2 = jnp.where(col < n_class, h2, -1e30)
        m = jnp.max(h2, axis=1, keepdims=True)
        z = h2 - m
        lse = jnp.log(jnp.sum(jnp.exp(z), axis=1, keepdims=True))
        out_ref[...] = z - lse


# --------------------------------------------------------------------------
# One-time prepare: pad + cast (adj is typically static across inference calls,
# so this should be done once and reused -- not inside the per-call forward).
# --------------------------------------------------------------------------
def prepare_gcn_inputs(x, adj, w1, b1, w2, b2):
    N, F_in = x.shape
    H = w1.shape[1]
    C = w2.shape[1]

    Fp = _round_up(F_in, _LANE)
    Hp = _round_up(H, _LANE)
    Cp = _round_up(C, _LANE)

    if N <= 512:
        Np = _round_up(max(N, _LANE), _LANE)
        tm = tk = Np
        fused = True
    else:
        Np, tm = _pick_padding_and_tile(N)
        tk = tm
        fused = False

    bf16, f32 = jnp.bfloat16, jnp.float32
    # Cast to bf16 *before* padding: no full-size f32 intermediates.
    x_p = jnp.zeros((Np, Fp), bf16).at[:N, :F_in].set(x.astype(bf16))
    adj_p = jnp.zeros((Np, Np), bf16).at[:N, :N].set(adj.astype(bf16))
    w1_p = jnp.zeros((Fp, Hp), bf16).at[:F_in, :H].set(w1.astype(bf16))
    w2_p = jnp.zeros((Hp, Cp), bf16).at[:H, :C].set(w2.astype(bf16))
    b1_p = jnp.zeros((1, Hp), f32).at[:, :H].set(b1.reshape(1, H).astype(f32))
    b2_p = jnp.zeros((1, Cp), f32).at[:, :C].set(b2.reshape(1, C).astype(f32))

    meta = dict(N=N, C=C, tm=tm, tk=tk, fused=fused)
    return (x_p, adj_p, w1_p, b1_p, w2_p, b2_p), meta


# --------------------------------------------------------------------------
# Forward on pre-padded inputs.
# --------------------------------------------------------------------------
@functools.partial(jax.jit, static_argnames=("N", "C", "tm", "tk", "fused"))
def gcn_forward_padded(x_p, adj_p, w1_p, b1_p, w2_p, b2_p, *, N, C, tm, tk,
                       fused):
    Np, Fp = x_p.shape
    Hp = w1_p.shape[1]
    Cp = w2_p.shape[1]
    bf16 = jnp.bfloat16

    if fused:
        out_p = pl.pallas_call(
            functools.partial(_fused_kernel, n_class=C),
            out_shape=jax.ShapeDtypeStruct((Np, Cp), jnp.float32),
            grid=(1,),
            in_specs=[pl.BlockSpec((Np, Fp), lambda i: (0, 0)),
                      pl.BlockSpec((Np, Np), lambda i: (0, 0)),
                      pl.BlockSpec((Fp, Hp), lambda i: (0, 0)),
                      pl.BlockSpec((1, Hp), lambda i: (0, 0)),
                      pl.BlockSpec((Hp, Cp), lambda i: (0, 0)),
                      pl.BlockSpec((1, Cp), lambda i: (0, 0))],
            out_specs=pl.BlockSpec((Np, Cp), lambda i: (0, 0)),
            compiler_params=pltpu.CompilerParams(
                dimension_semantics=("arbitrary",),
                vmem_limit_bytes=_VMEM_LIMIT),
            cost_estimate=pl.CostEstimate(
                flops=2 * Np * (Fp * Hp + Np * Hp + Hp * Cp + Np * Cp),
                transcendentals=Np * Cp,
                bytes_accessed=(2 * (Np * Fp + Np * Np + Fp * Hp + Hp * Cp)
                                + 4 * (Hp + Cp + Np * Cp))),
        )(x_p, adj_p, w1_p, b1_p, w2_p, b2_p)
        return out_p[:N, :C]

    cparams_rows = pltpu.CompilerParams(
        dimension_semantics=("parallel",), vmem_limit_bytes=_VMEM_LIMIT)
    cparams_tiled = pltpu.CompilerParams(
        dimension_semantics=("parallel", "arbitrary"),
        vmem_limit_bytes=_VMEM_LIMIT)

    # ---- kernel A: s1 = x @ W1 -------------------------------------------
    s1 = pl.pallas_call(
        _xw_kernel,
        out_shape=jax.ShapeDtypeStruct((Np, Hp), bf16),
        grid=(Np // tm,),
        in_specs=[pl.BlockSpec((tm, Fp), lambda i: (i, 0)),
                  pl.BlockSpec((Fp, Hp), lambda i: (0, 0))],
        out_specs=pl.BlockSpec((tm, Hp), lambda i: (i, 0)),
        compiler_params=cparams_rows,
        cost_estimate=pl.CostEstimate(
            flops=2 * Np * Fp * Hp, transcendentals=0,
            bytes_accessed=2 * (Np * Fp + Fp * Hp + Np * Hp)),
    )(x_p, w1_p)

    grid = (Np // tm, Np // tk)

    # ---- kernel B: s2 = (adj @ s1 + b1) @ W2 -------------------------------
    s2 = pl.pallas_call(
        functools.partial(_agg_linear_kernel, tk=tk),
        out_shape=jax.ShapeDtypeStruct((Np, Cp), bf16),
        grid=grid,
        in_specs=[pl.BlockSpec((tm, tk), lambda i, k: (i, k)),    # adj tile
                  pl.BlockSpec((Np, Hp), lambda i, k: (0, 0)),    # s1 (resident)
                  pl.BlockSpec((Hp, Cp), lambda i, k: (0, 0)),    # W2 (resident)
                  pl.BlockSpec((1, Hp), lambda i, k: (0, 0))],    # b1 (resident)
        out_specs=pl.BlockSpec((tm, Cp), lambda i, k: (i, 0)),
        scratch_shapes=[pltpu.VMEM((tm, Hp), jnp.float32)],
        compiler_params=cparams_tiled,
        cost_estimate=pl.CostEstimate(
            flops=2 * Np * Np * Hp + 2 * Np * Hp * Cp, transcendentals=0,
            bytes_accessed=(2 * Np * Np + 2 * Np * Hp + 2 * Hp * Cp
                            + 4 * Hp + 2 * Np * Cp)),
    )(adj_p, s1, w2_p, b1_p)

    # ---- kernel C: log_softmax(adj @ s2 + b2) ------------------------------
    out_p = pl.pallas_call(
        functools.partial(_agg_logsoftmax_kernel, tk=tk, n_class=C),
        out_shape=jax.ShapeDtypeStruct((Np, Cp), jnp.float32),
        grid=grid,
        in_specs=[pl.BlockSpec((tm, tk), lambda i, k: (i, k)),    # adj tile
                  pl.BlockSpec((Np, Cp), lambda i, k: (0, 0)),    # s2 (resident)
                  pl.BlockSpec((1, Cp), lambda i, k: (0, 0))],    # b2 (resident)
        out_specs=pl.BlockSpec((tm, Cp), lambda i, k: (i, 0)),
        scratch_shapes=[pltpu.VMEM((tm, Cp), jnp.float32)],
        compiler_params=cparams_tiled,
        cost_estimate=pl.CostEstimate(
            flops=2 * Np * Np * Cp, transcendentals=Np * Cp,
            bytes_accessed=(2 * Np * Np + 2 * Np * Cp + 4 * Cp
                            + 4 * Np * Cp)),
    )(adj_p, s2, b2_p)

    # Lane-dense padded output; slice back to the real (N, C) shape.
    return out_p[:N, :C]


def gcn_class_forward(x, adj, w1, b1, w2, b2):
    """Convenience one-shot API (pads every call; prefer prepare_gcn_inputs +
    gcn_forward_padded when adj/weights are static across calls)."""
    padded, meta = prepare_gcn_inputs(x, adj, w1, b1, w2, b2)
    return gcn_forward_padded(*padded, **meta)


# --------------------------------------------------------------------------
# Self-test
# --------------------------------------------------------------------------
def _reference(x, adj, w1, b1, w2, b2):
    h1 = adj @ (x @ w1) + b1
    h2 = adj @ (h1 @ w2) + b2
    return jax.nn.log_softmax(h2, axis=1)


def _make_problem(key, N, F_in, H, C):
    kx, kadj, kw1, kb1, kw2, kb2 = jax.random.split(key, 6)
    x = jax.random.normal(kx, (N, F_in), dtype=jnp.float32)
    # Symmetric adjacency with self loops, row-normalized in f32.
    a = (jax.random.uniform(kadj, (N, N)) > 0.7).astype(jnp.float32)
    a = jnp.maximum(a, a.T) + jnp.eye(N, dtype=jnp.float32)
    adj = a / jnp.sum(a, axis=1, keepdims=True)
    # PyTorch-style GCN init: uniform(-stdv, stdv), stdv = 1/sqrt(out_features)
    stdv1 = 1.0 / jnp.sqrt(float(H))
    w1 = jax.random.uniform(kw1, (F_in, H), minval=-stdv1, maxval=stdv1,
                            dtype=jnp.float32)
    b1 = jax.random.uniform(kb1, (1, H), minval=-stdv1, maxval=stdv1,
                            dtype=jnp.float32)
    stdv2 = 1.0 / jnp.sqrt(float(C))
    w2 = jax.random.uniform(kw2, (H, C), minval=-stdv2, maxval=stdv2,
                            dtype=jnp.float32)
    b2 = jax.random.uniform(kb2, (1, C), minval=-stdv2, maxval=stdv2,
                            dtype=jnp.float32)
    return x, adj, w1, b1, w2, b2


if __name__ == "__main__":
    # Small problem (fused single-kernel path): N=32 nodes, F=16, H=32, C=8.
    args = _make_problem(jax.random.PRNGKey(0), 32, 16, 32, 8)
    padded, meta = prepare_gcn_inputs(*args)        # one-time pad + bf16 cast
    out = gcn_forward_padded(*padded, **meta)
    jax.block_until_ready(out)
    ref = _reference(*args)
    assert out.shape == (32, 8)
    # bf16 MXU inputs with f32 accumulation -> loosened tolerance vs f32 ref.
    assert jnp.allclose(out, ref, atol=3e-2, rtol=3e-2), "small-case mismatch"

    # Larger problem (tiled path; N=640 pads to 640, tile=128, no over-padding).
    args = _make_problem(jax.random.PRNGKey(1), 640, 16, 32, 8)
    padded, meta = prepare_gcn_inputs(*args)
    out = gcn_forward_padded(*padded, **meta)
    jax.block_until_ready(out)
    ref = _reference(*args)
    assert out.shape == (640, 8)
    assert jnp.allclose(out, ref, atol=3e-2, rtol=3e-2), "tiled-case mismatch"

    print("KERNEL_OK")
</pallas_src>

<mosaic_0001>
module attributes {stable_mosaic.version = 11 : i64} {
  func.func @_fused_kernel(%arg0: i32, %arg1: memref<128x128xbf16, #tpu.memory_space<vmem>>, %arg2: memref<128x128xbf16, #tpu.memory_space<vmem>>, %arg3: memref<128x128xbf16, #tpu.memory_space<vmem>>, %arg4: memref<1x128xf32, #tpu.memory_space<vmem>>, %arg5: memref<128x128xbf16, #tpu.memory_space<vmem>>, %arg6: memref<1x128xf32, #tpu.memory_space<vmem>>, %arg7: memref<128x128xf32, #tpu.memory_space<vmem>>) attributes {dimension_semantics = [#tpu.dimension_semantics<arbitrary>], iteration_bounds = array<i64: 1>, scalar_prefetch = 0 : i64, scratch_operands = 0 : i64, tpu.core_type = #tpu.core_type<tc>, window_params = [{pipeline_mode = #tpu.pipeline_mode<synchronous>, transform_indices = @transform_0, window_bounds = array<i64: 128, 128>}, {pipeline_mode = #tpu.pipeline_mode<synchronous>, transform_indices = @transform_1, window_bounds = array<i64: 128, 128>}, {pipeline_mode = #tpu.pipeline_mode<synchronous>, transform_indices = @transform_2, window_bounds = array<i64: 128, 128>}, {pipeline_mode = #tpu.pipeline_mode<synchronous>, transform_indices = @transform_3, window_bounds = array<i64: 1, 128>}, {pipeline_mode = #tpu.pipeline_mode<synchronous>, transform_indices = @transform_4, window_bounds = array<i64: 128, 128>}, {pipeline_mode = #tpu.pipeline_mode<synchronous>, transform_indices = @transform_5, window_bounds = array<i64: 1, 128>}, {pipeline_mode = #tpu.pipeline_mode<synchronous>, transform_indices = @transform_6, window_bounds = array<i64: 128, 128>}]} {
    %c0 = arith.constant 0 : index
    %c0_0 = arith.constant 0 : index
    %0 = vector.load %arg2[%c0, %c0_0] : memref<128x128xbf16, #tpu.memory_space<vmem>>, vector<128x128xbf16>
    %c0_1 = arith.constant 0 : index
    %c0_2 = arith.constant 0 : index
    %1 = vector.load %arg1[%c0_1, %c0_2] : memref<128x128xbf16, #tpu.memory_space<vmem>>, vector<128x128xbf16>
    %c0_3 = arith.constant 0 : index
    %c0_4 = arith.constant 0 : index
    %2 = vector.load %arg3[%c0_3, %c0_4] : memref<128x128xbf16, #tpu.memory_space<vmem>>, vector<128x128xbf16>
    %cst = arith.constant dense<0.000000e+00> : vector<128x128xf32>
    %3 = tpu.matmul %1, %2, %cst {dimension_numbers = #tpu.dot_dimension_numbers<[1], [0], [0], [1], [0, 0, 1, 1], [], []>} : vector<128x128xbf16>, vector<128x128xbf16>, vector<128x128xf32> -> vector<128x128xf32>
    %4 = arith.truncf %3 : vector<128x128xf32> to vector<128x128xbf16>
    %cst_5 = arith.constant dense<0.000000e+00> : vector<128x128xf32>
    %5 = tpu.matmul %0, %4, %cst_5 {dimension_numbers = #tpu.dot_dimension_numbers<[1], [0], [0], [1], [0, 0, 1, 1], [], []>} : vector<128x128xbf16>, vector<128x128xbf16>, vector<128x128xf32> -> vector<128x128xf32>
    %c0_6 = arith.constant 0 : index
    %c0_7 = arith.constant 0 : index
    %6 = vector.load %arg4[%c0_6, %c0_7] : memref<1x128xf32, #tpu.memory_space<vmem>>, vector<1x128xf32>
    %7 = vector.broadcast %6 : vector<1x128xf32> to vector<128x128xf32>
    %8 = arith.addf %5, %7 : vector<128x128xf32>
    %9 = arith.truncf %8 : vector<128x128xf32> to vector<128x128xbf16>
    %c0_8 = arith.constant 0 : index
    %c0_9 = arith.constant 0 : index
    %10 = vector.load %arg5[%c0_8, %c0_9] : memref<128x128xbf16, #tpu.memory_space<vmem>>, vector<128x128xbf16>
    %cst_10 = arith.constant dense<0.000000e+00> : vector<128x128xf32>
    %11 = tpu.matmul %9, %10, %cst_10 {dimension_numbers = #tpu.dot_dimension_numbers<[1], [0], [0], [1], [0, 0, 1, 1], [], []>} : vector<128x128xbf16>, vector<128x128xbf16>, vector<128x128xf32> -> vector<128x128xf32>
    %12 = arith.truncf %11 : vector<128x128xf32> to vector<128x128xbf16>
    %cst_11 = arith.constant dense<0.000000e+00> : vector<128x128xf32>
    %13 = tpu.matmul %0, %12, %cst_11 {dimension_numbers = #tpu.dot_dimension_numbers<[1], [0], [0], [1], [0, 0, 1, 1], [], []>} : vector<128x128xbf16>, vector<128x128xbf16>, vector<128x128xf32> -> vector<128x128xf32>
    %c0_12 = arith.constant 0 : index
    %c0_13 = arith.constant 0 : index
    %14 = vector.load %arg6[%c0_12, %c0_13] : memref<1x128xf32, #tpu.memory_space<vmem>>, vector<1x128xf32>
    %15 = vector.broadcast %14 : vector<1x128xf32> to vector<128x128xf32>
    %16 = arith.addf %13, %15 : vector<128x128xf32>
    %17 = tpu.iota {dimensions = array<i32: 1>} : vector<128x128xi32>
    %c8_i32 = arith.constant 8 : i32
    %18 = vector.broadcast %c8_i32 : i32 to vector<128x128xi32>
    %19 = arith.cmpi slt, %17, %18 : vector<128x128xi32>
    %cst_14 = arith.constant -1.000000e+30 : f32
    %20 = vector.broadcast %cst_14 : f32 to vector<128x128xf32>
    %21 = arith.select %19, %16, %20 : vector<128x128xi1>, vector<128x128xf32>
    %cst_15 = arith.constant dense<0xFF800000> : vector<128xf32>
    %22 = vector.multi_reduction <maximumf>, %21, %cst_15 [1] : vector<128x128xf32> to vector<128xf32>
    %23 = vector.shape_cast %22 : vector<128xf32> to vector<128x1xf32>
    %24 = vector.broadcast %23 : vector<128x1xf32> to vector<128x128xf32>
    %25 = arith.subf %21, %24 : vector<128x128xf32>
    %26 = math.exp %25 : vector<128x128xf32>
    %cst_16 = arith.constant dense<0.000000e+00> : vector<128xf32>
    %27 = vector.multi_reduction <add>, %26, %cst_16 [1] : vector<128x128xf32> to vector<128xf32>
    %28 = vector.shape_cast %27 : vector<128xf32> to vector<128x1xf32>
    %29 = math.log %28 : vector<128x1xf32>
    %30 = vector.broadcast %29 : vector<128x1xf32> to vector<128x128xf32>
    %31 = arith.subf %25, %30 : vector<128x128xf32>
    %c0_17 = arith.constant 0 : index
    %c0_18 = arith.constant 0 : index
    %32 = vector.load %arg7[%c0_17, %c0_18] : memref<128x128xf32, #tpu.memory_space<vmem>>, vector<128x128xf32>
    tpu.vector_store %arg7[%c0_17, %c0_18], %31 {strides = array<i32>} : memref<128x128xf32, #tpu.memory_space<vmem>>, vector<128x128xf32>,
    return
  }
  func.func @transform_0(%arg0: i32) -> (i32, i32) {
    %c0_i32 = arith.constant 0 : i32
    %c0_i32_0 = arith.constant 0 : i32
    %c0_i32_1 = arith.constant 0 : i32
    return %c0_i32, %c0_i32_0 : i32, i32
  }
  func.func @transform_1(%arg0: i32) -> (i32, i32) {
    %c0_i32 = arith.constant 0 : i32
    %c0_i32_0 = arith.constant 0 : i32
    %c0_i32_1 = arith.constant 0 : i32
    return %c0_i32, %c0_i32_0 : i32, i32
  }
  func.func @transform_2(%arg0: i32) -> (i32, i32) {
    %c0_i32 = arith.constant 0 : i32
    %c0_i32_0 = arith.constant 0 : i32
    %c0_i32_1 = arith.constant 0 : i32
    return %c0_i32, %c0_i32_0 : i32, i32
  }
  func.func @transform_3(%arg0: i32) -> (i32, i32) {
    %c0_i32 = arith.constant 0 : i32
    %c0_i32_0 = arith.constant 0 : i32
    %c0_i32_1 = arith.constant 0 : i32
    return %c0_i32, %c0_i32_0 : i32, i32
  }
  func.func @transform_4(%arg0: i32) -> (i32, i32) {
    %c0_i32 = arith.constant 0 : i32
    %c0_i32_0 = arith.constant 0 : i32
    %c0_i32_1 = arith.constant 0 : i32
    return %c0_i32, %c0_i32_0 : i32, i32
  }
  func.func @transform_5(%arg0: i32) -> (i32, i32) {
    %c0_i32 = arith.constant 0 : i32
    %c0_i32_0 = arith.constant 0 : i32
    %c0_i32_1 = arith.constant 0 : i32
    return %c0_i32, %c0_i32_0 : i32, i32
  }
  func.func @transform_6(%arg0: i32) -> (i32, i32) {
    %c0_i32 = arith.constant 0 : i32
    %c0_i32_0 = arith.constant 0 : i32
    %c0_i32_1 = arith.constant 0 : i32
    return %c0_i32, %c0_i32_0 : i32, i32
  }
}

</mosaic_0001>

<bundles_post_ra>
// kernel: gcn_forward_padded.1
= control target key start
LH: loop header
LB: loop body
LE: loop exit
PB: predicated region body
PF: predicated region fallthrough
CT: control target
= control target key end

     0   :  { %11 = vsyncpa [#allocation3], 0  ;;  %s1651_s0 = inlined_call_operand.hbm [shape: bf16[128,128], index: 0, kind: input, shape index: {}]   ;;  %s1652_s1 = inlined_call_operand.hbm [shape: bf16[128,128], index: 1, kind: input, shape index: {}]   ;;  %s1653_s2 = inlined_call_operand.hbm [shape: bf16[128,128], index: 2, kind: input, shape index: {}]   ;;  %s1654_s3 = inlined_call_operand.vmem [shape: f32[1,128], index: 3, kind: input, shape index: {}]   ;;  %s1655_s4 = inlined_call_operand.hbm [shape: bf16[128,128], index: 4, kind: input, shape index: {}]   ;;  %s1656_s5 = inlined_call_operand.vmem [shape: f32[1,128], index: 5, kind: input, shape index: {}]   ;;  %s1657_s6 = inlined_call_operand.vmem [shape: f32[128,128], index: 6, kind: output, shape index: {}]  }
   0x1   :  { %12 = vsyncpa [#allocation5], 0 }
   0x2   :  { %13 = vsyncpa [#allocation8], 0  ;;  %s1377_s21 = smov [#allocation4]   ;;  %s1378_s23 = smov [#allocation2]  }
   0x3   :  { %s31_s22 = sshll.u32 %s1377_s21, 4  ;;  %s19_s24 = sshll.u32 %s1378_s23, 4  ;;  %s32_s22 = int_to_ptr.vmem [resolvable:$true] %s31_s22  ;;  %s20_s24 = int_to_ptr.vmem [resolvable:$true] %s19_s24 }
   0x4   :  { %s1299_s25 = scalar_lea.vmem %s32_s22, 1024  ;;  %p1304_p1 = scmp.lt.s32.totalorder %s32_s22, %s32_s22 }
   0x5   :  { %p1300_p0 = scmp.ne.s32.totalorder %s32_s22, %s1299_s25  ;;  %p1305_p2 = scmp.lt.s32.totalorder %s1299_s25, %s1299_s25 }
   0x7   :  { %p1306_p3 = por %p1305_p2, %p1304_p1 }
   0x9   :  { %p1307_p4 = pnand %p1306_p3, %p1300_p0 }
   0xb   :  { %1310 = shalt.err (!%p1307_p4)
}
   0xc   :  { %s1379_s26 = smov 64   ;;  %s1380_s27 = smov 4  }
   0xd   :  { %37 = dma.hbm_to_vmem [thread:$0]  %s1652_s1, 1024, %s32_s22, [#allocation5], %s1379_s26, %s1379_s26, %s1380_s27  }
   0xe   :  { %s1319_s30 = scalar_lea.vmem %s20_s24, 1024  ;;  %p1324_p6 = scmp.lt.s32.totalorder %s20_s24, %s20_s24 }
   0xf   :  { %p1320_p5 = scmp.ne.s32.totalorder %s20_s24, %s1319_s30  ;;  %p1325_p7 = scmp.lt.s32.totalorder %s1319_s30, %s1319_s30 }
  0x11   :  { %p1326_p8 = por %p1325_p7, %p1324_p6 }
  0x13   :  { %p1327_p9 = pnand %p1326_p8, %p1320_p5 }
  0x15   :  { %1330 = shalt.err (!%p1327_p9)
}
  0x16   :  { %25 = dma.hbm_to_vmem [thread:$0]  %s1651_s0, 1024, %s20_s24, [#allocation3], %s1379_s26, %s1379_s26, %s1380_s27  }
  0x17   :  { %s1381_s9 = smov [#allocation6]   ;;  %s1382_s11 = smov [#allocation7]  }
  0x18   :  { %s43_s10 = sshll.u32 %s1381_s9, 4  ;;  %s57_s12 = sshll.u32 %s1382_s11, 4  ;;  %s44_s10 = int_to_ptr.vmem [resolvable:$true] %s43_s10  ;;  %s58_s12 = int_to_ptr.vmem [resolvable:$true] %s57_s12 }
  0x19   :  { %s1339_s1 = scalar_lea.vmem %s44_s10, 1024  ;;  %p1344_p11 = scmp.lt.s32.totalorder %s44_s10, %s44_s10 }
  0x1a   :  { %p1340_p10 = scmp.ne.s32.totalorder %s44_s10, %s1339_s1  ;;  %p1345_p12 = scmp.lt.s32.totalorder %s1339_s1, %s1339_s1 }
  0x1c   :  { %p1346_p13 = por %p1345_p12, %p1344_p11 }
  0x1e   :  { %p1347_p0 = pnand %p1346_p13, %p1340_p10 }
  0x20   :  { %1350 = shalt.err (!%p1347_p0)
}
  0x21   :  { %49 = dma.hbm_to_vmem [thread:$0]  %s1653_s2, 1024, %s44_s10, [#allocation5], %s1379_s26, %s1379_s26, %s1380_s27  }
  0x22   :  { %s1359_s0 = scalar_lea.vmem %s58_s12, 1024  ;;  %p1364_p2 = scmp.lt.s32.totalorder %s58_s12, %s58_s12 }
  0x23   :  { %p1360_p1 = scmp.ne.s32.totalorder %s58_s12, %s1359_s0  ;;  %p1365_p3 = scmp.lt.s32.totalorder %s1359_s0, %s1359_s0 }
  0x25   :  { %p1366_p4 = por %p1365_p3, %p1364_p2 }
  0x27   :  { %p1367_p5 = pnand %p1366_p4, %p1360_p1 }
  0x29   :  { %1370 = shalt.err (!%p1367_p5)
}
  0x2a   :  { %63 = dma.hbm_to_vmem [thread:$0]  %s1655_s4, 1024, %s58_s12, [#allocation8], %s1379_s26, %s1379_s26, %s1380_s27  }
  0x2b   :  { %1371 = dma.done.wait [#allocation3], 1024  }
  0x2c   :  { %1372 = vsyncadd [#allocation3], 4294966272 }
  0x2d   :  { %1373 = dma.done.wait [#allocation5], 2048  }
  0x2e   :  { %1374 = vsyncadd [#allocation5], 4294965248 }
  0x2f   :  { %1375 = dma.done.wait [#allocation8], 1024  }
  0x30   :  { %1376 = vsyncadd [#allocation8], 4294966272  ;;  %v1195_v0 = vld [vmem:[#allocation6 + $0x38] sm:$0xff]   ;;  %v1196_v1 = vld [vmem:[#allocation6 + $0x30] sm:$0xff]  }
  0x31   :  { %1061 = vmatprep.subr.bf16.mxu0 %v1195_v0  ;;  %v1197_v2 = vld [vmem:[#allocation6 + $0x28] sm:$0xff]   ;;  %v1198_v3 = vld [vmem:[#allocation6 + $0x20] sm:$0xff]   ;;  %v1199_v5 = vld [vmem:[#allocation6 + $0x18] sm:$0xff]  }
  0x32   :  { %1062 = vmatpush3.bf16.msra.mxu0 %v1195_v0  ;;  %v1203_v4 = vld [vmem:[#allocation2] sm:$0xff]   ;;  %v1200_v6 = vld [vmem:[#allocation6 + $0x10] sm:$0xff]   ;;  %v1201_v7 = vld [vmem:[#allocation6 + $0x8] sm:$0xff]  }
  0x33   :  { %1063 = vmatprep.subr.bf16.mxu0 %v1196_v1  ;;  %1077 = vmatprep.mubr.bf16.mxu0 %v1203_v4  ;;  %v1202_v8 = vld [vmem:[#allocation6] sm:$0xff]   ;;  %v1204_v9 = vld [vmem:[#allocation2 + $0x8] sm:$0xff]   ;;  %v1205_v10 = vld [vmem:[#allocation2 + $0x10] sm:$0xff]  }
  0x34   :  { %v1206_v11 = vld [vmem:[#allocation2 + $0x18] sm:$0xff]   ;;  %v1207_v12 = vld [vmem:[#allocation2 + $0x20] sm:$0xff]   ;;  %v1208_v13 = vld [vmem:[#allocation2 + $0x28] sm:$0xff]  }
  0x35   :  { %v1209_v14 = vld [vmem:[#allocation2 + $0x30] sm:$0xff]   ;;  %v1210_v15 = vld [vmem:[#allocation2 + $0x38] sm:$0xff]   ;;  %v1442_v16 = vld [vmem:[#allocation4] sm:$0xff]  }
  0x36   :  { %1064 = vmatpush3.bf16.msra.mxu0 %v1196_v1  ;;  %1109 = vmatprep.mubr.bf16.mxu1 %v1442_v16  ;;  %v1219_v17 = vld [vmem:[#allocation7 + $0x38] sm:$0xff]   ;;  %v1220_v18 = vld [vmem:[#allocation7 + $0x30] sm:$0xff]   ;;  %v1221_v19 = vld [vmem:[#allocation7 + $0x28] sm:$0xff]  }
  0x37   :  { %1065 = vmatprep.subr.bf16.mxu0 %v1197_v2  ;;  %v1222_v20 = vld [vmem:[#allocation7 + $0x20] sm:$0xff]   ;;  %v1223_v21 = vld [vmem:[#allocation7 + $0x18] sm:$0xff]   ;;  %v1445_v46 = vld [vmem:[#allocation4 + $0x8] sm:$0xff]  }
  0x38   :  { %v1447_v47 = vld [vmem:[#allocation4 + $0x10] sm:$0xff]   ;;  %v1451_v48 = vld [vmem:[#allocation4 + $0x18] sm:$0xff]   ;;  %v1453_v49 = vld [vmem:[#allocation4 + $0x20] sm:$0xff]  }
  0x39   :  { %v1457_v50 = vld [vmem:[#allocation4 + $0x28] sm:$0xff]   ;;  %v1459_v51 = vld [vmem:[#allocation4 + $0x30] sm:$0xff]   ;;  %v1463_v52 = vld [vmem:[#allocation4 + $0x38] sm:$0xff]  }
  0x3a   :  { %1066 = vmatpush3.bf16.msra.mxu0 %v1197_v2  ;;  %v1224_v53 = vld [vmem:[#allocation7 + $0x10] sm:$0xff]   ;;  %v1225_v54 = vld [vmem:[#allocation7 + $0x8] sm:$0xff]   ;;  %v1226_v55 = vld [vmem:[#allocation7] sm:$0xff]  }
  0x3b   :  { %1067 = vmatprep.subr.bf16.mxu0 %v1198_v3  ;;  %v979_v59 = vld [vmem:[%s1654_s3] ss:$0 sm:$0xff] }
  0x3e   :  { %1068 = vmatpush3.bf16.msra.mxu0 %v1198_v3 }
  0x3f   :  { %1069 = vmatprep.subr.bf16.mxu0 %v1199_v5 }
  0x42   :  { %1070 = vmatpush3.bf16.msra.mxu0 %v1199_v5 }
  0x43   :  { %1071 = vmatprep.subr.bf16.mxu0 %v1200_v6 }
  0x46   :  { %1072 = vmatpush3.bf16.msra.mxu0 %v1200_v6 }
  0x47   :  { %1073 = vmatprep.subr.bf16.mxu0 %v1201_v7 }
  0x4a   :  { %1074 = vmatpush3.bf16.msra.mxu0 %v1201_v7 }
  0x4b   :  { %1075 = vmatprep.subr.bf16.mxu0 %v1202_v8 }
  0x4e   :  { %1076 = vmatpush3.bf16.msra.mxu0 %v1202_v8 }
  0x4f   :  { %1125 = vmatprep.subr.bf16.mxu0 %v1219_v17 }
  0x51   :  { %1078 = vmatmul.mubr.bf16.vlgmr.msra.gmra.mxu0 %v1204_v9 }
  0x52   :  { %1081 = vmatprep.mubr.bf16.mxu0 %v1205_v10  ;;  %1126 = vmatpush3.bf16.msra.mxu0 %v1219_v17 }
  0x53   :  { %1127 = vmatprep.subr.bf16.mxu0 %v1220_v18 }
  0x56   :  { %1128 = vmatpush3.bf16.msra.mxu0 %v1220_v18 }
  0x57   :  { %1129 = vmatprep.subr.bf16.mxu0 %v1221_v19 }
  0x59   :  { %1082 = vmatmul.mubr.bf16.gmra.mxu0 %v1206_v11 }
  0x5a   :  { %1085 = vmatprep.mubr.bf16.mxu0 %v1207_v12  ;;  %1130 = vmatpush3.bf16.msra.mxu0 %v1221_v19 }
  0x5b   :  { %1131 = vmatprep.subr.bf16.mxu0 %v1222_v20 }
  0x5e   :  { %1132 = vmatpush3.bf16.msra.mxu0 %v1222_v20 }
  0x5f   :  { %1133 = vmatprep.subr.bf16.mxu0 %v1223_v21 }
  0x61   :  { %1086 = vmatmul.mubr.bf16.gmra.mxu0 %v1208_v13 }
  0x62   :  { %1089 = vmatprep.mubr.bf16.mxu0 %v1209_v14  ;;  %1134 = vmatpush3.bf16.msra.mxu0 %v1223_v21 }
  0x63   :  { %1135 = vmatprep.subr.bf16.mxu0 %v1224_v53 }
  0x66   :  { %1136 = vmatpush3.bf16.msra.mxu0 %v1224_v53 }
  0x67   :  { %1137 = vmatprep.subr.bf16.mxu0 %v1225_v54 }
  0x69   :  { %1090 = vmatmul.mubr.bf16.gmra.mxu0 %v1210_v15 }
  0x6a   :  { %1138 = vmatpush3.bf16.msra.mxu0 %v1225_v54 }
  0x6b   :  { %1139 = vmatprep.subr.bf16.mxu0 %v1226_v55 }
  0x6e   :  { %1140 = vmatpush3.bf16.msra.mxu0 %v1226_v55 }
 0x111   :  { %v1079_v22 = vpop.f32.mrf.mxu0 }
 0x113   :  { %v257_v23 = vpop.f32.mrf.mxu0 }
 0x115   :  { %v1080_v24 = vpop.f32.mrf.mxu0 }
 0x116   :  { %v321_v44 = vpack.c.bf16 %v1080_v24, %v1079_v22 }
 0x117   :  { %v260_v25 = vpop.f32.mrf.mxu0 }
 0x118   :  { %v320_v45 = vpack.c.bf16 %v260_v25, %v257_v23 }
 0x119   :  { %v1083_v26 = vpop.f32.mrf.mxu0 }
 0x11b   :  { %v273_v27 = vpop.f32.mrf.mxu0 }
 0x11d   :  { %v1084_v28 = vpop.f32.mrf.mxu0 }
 0x11e   :  { %v323_v42 = vpack.c.bf16 %v1084_v28, %v1083_v26 }
 0x11f   :  { %v276_v29 = vpop.f32.mrf.mxu0 }
 0x120   :  { %v322_v43 = vpack.c.bf16 %v276_v29, %v273_v27 }
 0x121   :  { %v1087_v30 = vpop.f32.mrf.mxu0 }
 0x123   :  { %v289_v31 = vpop.f32.mrf.mxu0 }
 0x125   :  { %v1088_v32 = vpop.f32.mrf.mxu0 }
 0x126   :  { %v325_v40 = vpack.c.bf16 %v1088_v32, %v1087_v30 }
 0x127   :  { %v292_v33 = vpop.f32.mrf.mxu0 }
 0x128   :  { %v324_v41 = vpack.c.bf16 %v292_v33, %v289_v31 }
 0x129   :  { %v1091_v34 = vpop.f32.mrf.mxu0 }
 0x12b   :  { %v305_v35 = vpop.f32.mrf.mxu0 }
 0x12d   :  { %v1092_v36 = vpop.f32.mrf.mxu0 }
 0x12e   :  { %v327_v37 = vpack.c.bf16 %v1092_v36, %v1091_v34 }
 0x12f   :  { %v308_v38 = vpop.f32.mrf.mxu0 }
 0x130   :  { %v326_v39 = vpack.c.bf16 %v308_v38, %v305_v35  ;;  %1093 = vmatprep.subr.bf16.mxu1 %v327_v37 }
 0x131   :  { %1094 = vmatpush3.bf16.msra.mxu1 %v327_v37 }
 0x132   :  { %1095 = vmatprep.subr.bf16.mxu1 %v326_v39 }
 0x135   :  { %1096 = vmatpush3.bf16.msra.mxu1 %v326_v39 }
 0x136   :  { %1097 = vmatprep.subr.bf16.mxu1 %v325_v40 }
 0x139   :  { %1098 = vmatpush3.bf16.msra.mxu1 %v325_v40 }
 0x13a   :  { %1099 = vmatprep.subr.bf16.mxu1 %v324_v41 }
 0x13d   :  { %1100 = vmatpush3.bf16.msra.mxu1 %v324_v41 }
 0x13e   :  { %1101 = vmatprep.subr.bf16.mxu1 %v323_v42 }
 0x141   :  { %1102 = vmatpush3.bf16.msra.mxu1 %v323_v42 }
 0x142   :  { %1103 = vmatprep.subr.bf16.mxu1 %v322_v43 }
 0x145   :  { %1104 = vmatpush3.bf16.msra.mxu1 %v322_v43 }
 0x146   :  { %1105 = vmatprep.subr.bf16.mxu1 %v321_v44 }
 0x149   :  { %1106 = vmatpush3.bf16.msra.mxu1 %v321_v44 }
 0x14a   :  { %1107 = vmatprep.subr.bf16.mxu1 %v320_v45 }
 0x14d   :  { %1108 = vmatpush3.bf16.msra.mxu1 %v320_v45 }
 0x150   :  { %1110 = vmatmul.mubr.bf16.vlgmr.msra.gmra.mxu1 %v1445_v46 }
 0x151   :  { %1113 = vmatprep.mubr.bf16.mxu1 %v1447_v47 }
 0x158   :  { %1114 = vmatmul.mubr.bf16.gmra.mxu1 %v1451_v48 }
 0x159   :  { %1117 = vmatprep.mubr.bf16.mxu1 %v1453_v49 }
 0x160   :  { %1118 = vmatmul.mubr.bf16.gmra.mxu1 %v1457_v50 }
 0x161   :  { %1121 = vmatprep.mubr.bf16.mxu1 %v1459_v51 }
 0x168   :  { %1122 = vmatmul.mubr.bf16.gmra.mxu1 %v1463_v52 }
 0x169   :  { %1173 = vmatprep.mubr.bf16.mxu1 %v1442_v16 }
 0x210   :  { %v1111_v56 = vpop.f32.mrf.mxu1 }
 0x211   :  { %v426_v0 = vadd.f32 %v1111_v56, %v979_v59 }
 0x212   :  { %v417_v57 = vpop.f32.mrf.mxu1 }
 0x213   :  { %v418_v62 = vadd.f32 %v979_v59, %v417_v57 }
 0x214   :  { %v1112_v58 = vpop.f32.mrf.mxu1 }
 0x215   :  { %v429_v60 = vadd.f32 %v1112_v58, %v979_v59 }
 0x216   :  { %v420_v61 = vpop.f32.mrf.mxu1 }
 0x217   :  { %v421_v63 = vadd.f32 %v979_v59, %v420_v61  ;;  %v481_v3 = vpack.c.bf16 %v429_v60, %v426_v0  ;;  %v761_v0 = vlaneseq }
 0x218   :  { %v1115_v1 = vpop.f32.mrf.mxu1 }
 0x219   :  { %v480_v2 = vpack.c.bf16 %v421_v63, %v418_v62  ;;  %v442_v10 = vadd.f32 %v1115_v1, %v979_v59  ;;  %v1477_v1 = vand.u32 127, %v761_v0 }
 0x21a   :  { %v433_v4 = vpop.f32.mrf.mxu1 }
 0x21b   :  { %1141 = vmatprep.mubr.bf16.mxu0 %v480_v2  ;;  %v434_v8 = vadd.f32 %v979_v59, %v433_v4  ;;  %v996_v2 = vld [vmem:[%s1656_s5] ss:$0 sm:$0xff]  ;;  %vm763_vm0 = vcmp.lt.s32.totalorder %v1477_v1, 8 }
 0x21c   :  { %v1116_v5 = vpop.f32.mrf.mxu1  ;;  %1142 = vmatmul.mubr.bf16.vlgmr.msra.gmra.mxu0 %v481_v3 }
 0x21d   :  { %v445_v6 = vadd.f32 %v1116_v5, %v979_v59 }
 0x21e   :  { %v436_v7 = vpop.f32.mrf.mxu1 }
 0x21f   :  { %v437_v9 = vadd.f32 %v979_v59, %v436_v7  ;;  %v483_v13 = vpack.c.bf16 %v445_v6, %v442_v10 }
 0x220   :  { %v1119_v11 = vpop.f32.mrf.mxu1 }
 0x221   :  { %v482_v12 = vpack.c.bf16 %v437_v9, %v434_v8  ;;  %v458_v20 = vadd.f32 %v1119_v11, %v979_v59 }
 0x222   :  { %v449_v14 = vpop.f32.mrf.mxu1 }
 0x223   :  { %1145 = vmatprep.mubr.bf16.mxu0 %v482_v12  ;;  %v450_v18 = vadd.f32 %v979_v59, %v449_v14 }
 0x224   :  { %v1120_v15 = vpop.f32.mrf.mxu1  ;;  %1146 = vmatmul.mubr.bf16.gmra.mxu0 %v483_v13 }
 0x225   :  { %v461_v16 = vadd.f32 %v1120_v15, %v979_v59 }
 0x226   :  { %v452_v17 = vpop.f32.mrf.mxu1 }
 0x227   :  { %v453_v19 = vadd.f32 %v979_v59, %v452_v17  ;;  %v485_v23 = vpack.c.bf16 %v461_v16, %v458_v20 }
 0x228   :  { %v1123_v21 = vpop.f32.mrf.mxu1 }
 0x229   :  { %v484_v22 = vpack.c.bf16 %v453_v19, %v450_v18  ;;  %v474_v30 = vadd.f32 %v1123_v21, %v979_v59 }
 0x22a   :  { %v465_v24 = vpop.f32.mrf.mxu1 }
 0x22b   :  { %1149 = vmatprep.mubr.bf16.mxu0 %v484_v22  ;;  %v466_v28 = vadd.f32 %v979_v59, %v465_v24 }
 0x22c   :  { %v1124_v25 = vpop.f32.mrf.mxu1  ;;  %1150 = vmatmul.mubr.bf16.gmra.mxu0 %v485_v23 }
 0x22d   :  { %v477_v26 = vadd.f32 %v1124_v25, %v979_v59 }
 0x22e   :  { %v468_v27 = vpop.f32.mrf.mxu1 }
 0x22f   :  { %v469_v29 = vadd.f32 %v979_v59, %v468_v27  ;;  %v487_v32 = vpack.c.bf16 %v477_v26, %v474_v30 }
 0x231   :  { %v486_v31 = vpack.c.bf16 %v469_v29, %v466_v28 }
 0x233   :  { %1153 = vmatprep.mubr.bf16.mxu0 %v486_v31 }
 0x234   :  { %1154 = vmatmul.mubr.bf16.gmra.mxu0 %v487_v32 }
 0x2dc   :  { %v1143_v33 = vpop.f32.mrf.mxu0 }
 0x2de   :  { %v586_v34 = vpop.f32.mrf.mxu0 }
 0x2e0   :  { %v1144_v35 = vpop.f32.mrf.mxu0 }
 0x2e1   :  { %v650_v62 = vpack.c.bf16 %v1144_v35, %v1143_v33 }
 0x2e2   :  { %v589_v36 = vpop.f32.mrf.mxu0 }
 0x2e3   :  { %v649_v63 = vpack.c.bf16 %v589_v36, %v586_v34 }
 0x2e4   :  { %v1147_v37 = vpop.f32.mrf.mxu0 }
 0x2e6   :  { %v602_v38 = vpop.f32.mrf.mxu0 }
 0x2e8   :  { %v1148_v39 = vpop.f32.mrf.mxu0 }
 0x2e9   :  { %v652_v60 = vpack.c.bf16 %v1148_v39, %v1147_v37 }
 0x2ea   :  { %v605_v40 = vpop.f32.mrf.mxu0 }
 0x2eb   :  { %v651_v61 = vpack.c.bf16 %v605_v40, %v602_v38 }
 0x2ec   :  { %v1151_v41 = vpop.f32.mrf.mxu0 }
 0x2ee   :  { %v618_v42 = vpop.f32.mrf.mxu0 }
 0x2f0   :  { %v1152_v43 = vpop.f32.mrf.mxu0 }
 0x2f1   :  { %v654_v58 = vpack.c.bf16 %v1152_v43, %v1151_v41 }
 0x2f2   :  { %v621_v44 = vpop.f32.mrf.mxu0 }
 0x2f3   :  { %v653_v59 = vpack.c.bf16 %v621_v44, %v618_v42 }
 0x2f4   :  { %v1155_v45 = vpop.f32.mrf.mxu0 }
 0x2f6   :  { %v634_v53 = vpop.f32.mrf.mxu0 }
 0x2f8   :  { %v1156_v54 = vpop.f32.mrf.mxu0 }
 0x2f9   :  { %v656_v55 = vpack.c.bf16 %v1156_v54, %v1155_v45 }
 0x2fa   :  { %v637_v56 = vpop.f32.mrf.mxu0 }
 0x2fb   :  { %v655_v57 = vpack.c.bf16 %v637_v56, %v634_v53  ;;  %1157 = vmatprep.subr.bf16.mxu1 %v656_v55 }
 0x2fc   :  { %1158 = vmatpush3.bf16.msra.mxu1 %v656_v55 }
 0x2fd   :  { %1159 = vmatprep.subr.bf16.mxu1 %v655_v57 }
 0x300   :  { %1160 = vmatpush3.bf16.msra.mxu1 %v655_v57 }
 0x301   :  { %1161 = vmatprep.subr.bf16.mxu1 %v654_v58 }
 0x304   :  { %1162 = vmatpush3.bf16.msra.mxu1 %v654_v58 }
 0x305   :  { %1163 = vmatprep.subr.bf16.mxu1 %v653_v59 }
 0x308   :  { %1164 = vmatpush3.bf16.msra.mxu1 %v653_v59 }
 0x309   :  { %1165 = vmatprep.subr.bf16.mxu1 %v652_v60 }
 0x30c   :  { %1166 = vmatpush3.bf16.msra.mxu1 %v652_v60 }
 0x30d   :  { %1167 = vmatprep.subr.bf16.mxu1 %v651_v61 }
 0x310   :  { %1168 = vmatpush3.bf16.msra.mxu1 %v651_v61 }
 0x311   :  { %1169 = vmatprep.subr.bf16.mxu1 %v650_v62 }
 0x314   :  { %1170 = vmatpush3.bf16.msra.mxu1 %v650_v62 }
 0x315   :  { %1171 = vmatprep.subr.bf16.mxu1 %v649_v63 }
 0x318   :  { %1172 = vmatpush3.bf16.msra.mxu1 %v649_v63 }
 0x31b   :  { %1174 = vmatmul.mubr.bf16.vlgmr.msra.gmra.mxu1 %v1445_v46 }
 0x31c   :  { %1177 = vmatprep.mubr.bf16.mxu1 %v1447_v47 }
 0x323   :  { %1178 = vmatmul.mubr.bf16.gmra.mxu1 %v1451_v48 }
 0x324   :  { %1181 = vmatprep.mubr.bf16.mxu1 %v1453_v49 }
 0x32b   :  { %1182 = vmatmul.mubr.bf16.gmra.mxu1 %v1457_v50 }
 0x32c   :  { %1185 = vmatprep.mubr.bf16.mxu1 %v1459_v51 }
 0x333   :  { %1186 = vmatmul.mubr.bf16.gmra.mxu1 %v1463_v52 }
 0x3db   :  { %v1175_v46 = vpop.f32.mrf.mxu1 }
 0x3dc   :  { %v707_v47 = vadd.f32 %v1175_v46, %v996_v2 }
 0x3dd   :  { %v698_v48 = vpop.f32.mrf.mxu1 }
 0x3de   :  { %v699_v3 = vadd.f32 %v996_v2, %v698_v48  ;;  %v766_v49 = vsel %vm763_vm0, %v707_v47, -1e+30 }
 0x3df   :  { %784 = vmax.xlane.f32.xlu1 %v766_v49  ;;  %v1176_v50 = vpop.f32.mrf.mxu1 }
 0x3e0   :  { %v710_v51 = vadd.f32 %v1176_v50, %v996_v2  ;;  %v764_v52 = vsel %vm763_vm0, %v699_v3, -1e+30 }
 0x3e1   :  { %v701_v4 = vpop.f32.mrf.mxu1  ;;  %780 = vmax.xlane.f32.xlu0 %v764_v52 }
 0x3e2   :  { %v702_v5 = vadd.f32 %v996_v2, %v701_v4  ;;  %v767_v6 = vsel %vm763_vm0, %v710_v51, -1e+30 }
 0x3e3   :  { %786 = vmax.xlane.f32.xlu1 %v767_v6  ;;  %v1179_v7 = vpop.f32.mrf.mxu1 }
 0x3e4   :  { %v723_v8 = vadd.f32 %v1179_v7, %v996_v2  ;;  %v765_v9 = vsel %vm763_vm0, %v702_v5, -1e+30 }
 0x3e5   :  { %v714_v10 = vpop.f32.mrf.mxu1  ;;  %782 = vmax.xlane.f32.xlu0 %v765_v9 }
 0x3e6   :  { %v715_v12 = vadd.f32 %v996_v2, %v714_v10  ;;  %v770_v14 = vsel %vm763_vm0, %v723_v8, -1e+30 }
 0x3e7   :  { %v1180_v11 = vpop.f32.mrf.mxu1 }
 0x3e8   :  { %v726_v13 = vadd.f32 %v1180_v11, %v996_v2  ;;  %v768_v20 = vsel %vm763_vm0, %v715_v12, -1e+30 }
 0x3e9   :  { %v717_v15 = vpop.f32.mrf.mxu1  ;;  %792 = vmax.xlane.f32.xlu0 %v770_v14 }
 0x3ea   :  { %v718_v16 = vadd.f32 %v996_v2, %v717_v15  ;;  %v771_v17 = vsel %vm763_vm0, %v726_v13, -1e+30 }
 0x3eb   :  { %794 = vmax.xlane.f32.xlu1 %v771_v17  ;;  %v1183_v18 = vpop.f32.mrf.mxu1 }
 0x3ec   :  { %v739_v19 = vadd.f32 %v1183_v18, %v996_v2  ;;  %v769_v22 = vsel %vm763_vm0, %v718_v16, -1e+30 }
 0x3ed   :  { %v730_v21 = vpop.f32.mrf.mxu1  ;;  %788 = vmax.xlane.f32.xlu0 %v768_v20 }
 0x3ee   :  { %v731_v24 = vadd.f32 %v996_v2, %v730_v21  ;;  %v774_v26 = vsel %vm763_vm0, %v739_v19, -1e+30 }
 0x3ef   :  { %v1184_v23 = vpop.f32.mrf.mxu1  ;;  %790 = vmax.xlane.f32.xlu1 %v769_v22 }
 0x3f0   :  { %v742_v25 = vadd.f32 %v1184_v23, %v996_v2  ;;  %v1505_v31 = vsel %vm763_vm0, %v731_v24, -1e+30 }
 0x3f1   :  { %v733_v27 = vpop.f32.mrf.mxu1  ;;  %800 = vmax.xlane.f32.xlu0 %v774_v26 }
 0x3f2   :  { %v734_v28 = vadd.f32 %v996_v2, %v733_v27  ;;  %v775_v29 = vsel %vm763_vm0, %v742_v25, -1e+30 }
 0x3f3   :  { %v1187_v30 = vpop.f32.mrf.mxu1  ;;  %802 = vmax.xlane.f32.xlu1 %v775_v29 }
 0x3f4   :  { %v1510_v34 = vsel %vm763_vm0, %v734_v28, -1e+30  ;;  %v755_v36 = vadd.f32 %v1187_v30, %v996_v2 }
 0x3f5   :  { %v746_v32 = vpop.f32.mrf.mxu1  ;;  %796 = vmax.xlane.f32.xlu0 %v1505_v31 }
 0x3f6   :  { %v747_v33 = vadd.f32 %v996_v2, %v746_v32  ;;  %v1524_v42 = vsel %vm763_vm0, %v755_v36, -1e+30 }
 0x3f7   :  { %v1188_v35 = vpop.f32.mrf.mxu1  ;;  %798 = vmax.xlane.f32.xlu1 %v1510_v34 }
 0x3f8   :  { %v1515_v37 = vsel %vm763_vm0, %v747_v33, -1e+30  ;;  %v758_v40 = vadd.f32 %v1188_v35, %v996_v2 }
 0x3f9   :  { %v749_v38 = vpop.f32.mrf.mxu1  ;;  %804 = vmax.xlane.f32.xlu0 %v1515_v37 }
 0x3fa   :  { %v750_v39 = vadd.f32 %v996_v2, %v749_v38  ;;  %v1530_v43 = vsel %vm763_vm0, %v758_v40, -1e+30 }
 0x3fc   :  { %v1520_v41 = vsel %vm763_vm0, %v750_v39, -1e+30 }
 0x3fd   :  { %806 = vmax.xlane.f32.xlu1 %v1520_v41  ;;  %808 = vmax.xlane.f32.xlu0 %v1524_v42 }
 0x401   :  { %810 = vmax.xlane.f32.xlu1 %v1530_v43 }
 0x468   :  { %v785_v44 = vpop.xlane.xlu1 %784 }
 0x469   :  { %v1533_v45 = vsub.f32 %v766_v49, %v785_v44 }
 0x46a   :  { %v781_v53 = vpop.xlane.xlu0 %780 }
 0x46b   :  { %v832_v54 = vmul.f32 1.442695, %v1533_v45  ;;  %v1536_v55 = vsub.f32 %v764_v52, %v781_v53 }
 0x46c   :  { %v787_v56 = vpop.xlane.xlu1 %786 }
 0x46d   :  { %1227 = vpow2.f32 %v832_v54  ;;  %v828_v57 = vmul.f32 1.442695, %v1536_v55  ;;  %v1539_v58 = vsub.f32 %v767_v6, %v787_v56 }
 0x46e   :  { %v783_v59 = vpop.xlane.xlu0 %782 }
 0x46f   :  { %v834_v60 = vmul.f32 1.442695, %v1539_v58  ;;  %v1542_v61 = vsub.f32 %v765_v9, %v783_v59  ;;  %1229 = vpow2.f32 %v828_v57 }
 0x471   :  { %1231 = vpow2.f32 %v834_v60  ;;  %v830_v62 = vmul.f32 1.442695, %v1542_v61 }
 0x472   :  { %v793_v63 = vpop.xlane.xlu0 %792 }
 0x473   :  { %v1545_v0 = vsub.f32 %v770_v14, %v793_v63  ;;  %1233 = vpow2.f32 %v830_v62 }
 0x474   :  { %v795_v1 = vpop.xlane.xlu1 %794 }
 0x475   :  { %v840_v2 = vmul.f32 1.442695, %v1545_v0  ;;  %v1548_v46 = vsub.f32 %v771_v17, %v795_v1 }
 0x476   :  { %v789_v47 = vpop.xlane.xlu0 %788 }
 0x477   :  { %1235 = vpow2.f32 %v840_v2  ;;  %v842_v48 = vmul.f32 1.442695, %v1548_v46  ;;  %v1551_v3 = vsub.f32 %v768_v20, %v789_v47 }
 0x478   :  { %v791_v49 = vpop.xlane.xlu1 %790 }
 0x479   :  { %1237 = vpow2.f32 %v842_v48  ;;  %v836_v50 = vmul.f32 1.442695, %v1551_v3  ;;  %v1554_v51 = vsub.f32 %v769_v22, %v791_v49 }
 0x47a   :  { %v1228_v52 = vpop.eup %1227  ;;  %v801_v4 = vpop.xlane.xlu0 %800 }
 0x47b   :  { %1239 = vpow2.f32 %v836_v50  ;;  %v838_v5 = vmul.f32 1.442695, %v1554_v51  ;;  %v1557_v6 = vsub.f32 %v774_v26, %v801_v4  ;;  %864 = vadd.xlane.f32.xlu0 %v1228_v52 }
 0x47c   :  { %v803_v7 = vpop.xlane.xlu1 %802  ;;  %v1230_v8 = vpop.eup %1229 }
 0x47d   :  { %1241 = vpow2.f32 %v838_v5  ;;  %v848_v9 = vmul.f32 1.442695, %v1557_v6  ;;  %v1560_v10 = vsub.f32 %v775_v29, %v803_v7 }
 0x47e   :  { %v1232_v11 = vpop.eup %1231  ;;  %v797_v12 = vpop.xlane.xlu0 %796 }
 0x47f   :  { %1243 = vpow2.f32 %v848_v9  ;;  %v850_v13 = vmul.f32 1.442695, %v1560_v10  ;;  %v1564_v14 = vsub.f32 %v1505_v31, %v797_v12  ;;  %866 = vadd.xlane.f32.xlu1 %v1232_v11  ;;  %860 = vadd.xlane.f32.xlu0 %v1230_v8 }
 0x480   :  { %v799_v15 = vpop.xlane.xlu1 %798  ;;  %v1234_v18 = vpop.eup %1233 }
 0x481   :  { %1245 = vpow2.f32 %v850_v13  ;;  %v844_v16 = vmul.f32 1.442695, %v1564_v14  ;;  %v1568_v17 = vsub.f32 %v1510_v34, %v799_v15 }
 0x482   :  { %v805_v19 = vpop.xlane.xlu0 %804 }
 0x483   :  { %1247 = vpow2.f32 %v844_v16  ;;  %v846_v20 = vmul.f32 1.442695, %v1568_v17  ;;  %v1572_v21 = vsub.f32 %v1515_v37, %v805_v19  ;;  %862 = vadd.xlane.f32.xlu1 %v1234_v18 }
 0x484   :  { %v1236_v22 = vpop.eup %1235 }
 0x485   :  { %1249 = vpow2.f32 %v846_v20  ;;  %v852_v23 = vmul.f32 1.442695, %v1572_v21  ;;  %872 = vadd.xlane.f32.xlu0 %v1236_v22 }
 0x486   :  { %v1238_v24 = vpop.eup %1237  ;;  %v807_v25 = vpop.xlane.xlu1 %806 }
 0x487   :  { %v809_v26 = vpop.xlane.xlu0 %808  ;;  %1251 = vpow2.f32 %v852_v23  ;;  %v1576_v27 = vsub.f32 %v1520_v41, %v807_v25  ;;  %874 = vadd.xlane.f32.xlu1 %v1238_v24 }
 0x488   :  { %v1579_v28 = vsub.f32 %v1524_v42, %v809_v26  ;;  %v1240_v29 = vpop.eup %1239 }
 0x489   :  { %v854_v30 = vmul.f32 1.442695, %v1576_v27  ;;  %868 = vadd.xlane.f32.xlu0 %v1240_v29 }
 0x48a   :  { %v856_v31 = vmul.f32 1.442695, %v1579_v28  ;;  %v1242_v32 = vpop.eup %1241  ;;  %v811_v33 = vpop.xlane.xlu1 %810 }
 0x48b   :  { %1253 = vpow2.f32 %v854_v30  ;;  %v1584_v34 = vsub.f32 %v1530_v43, %v811_v33  ;;  %870 = vadd.xlane.f32.xlu1 %v1242_v32 }
 0x48c   :  { %v1244_v35 = vpop.eup %1243  ;;  %1255 = vpow2.f32 %v856_v31 }
 0x48d   :  { %v858_v36 = vmul.f32 1.442695, %v1584_v34  ;;  %880 = vadd.xlane.f32.xlu0 %v1244_v35 }
 0x48e   :  { %v1246_v37 = vpop.eup %1245 }
 0x48f   :  { %1257 = vpow2.f32 %v858_v36  ;;  %882 = vadd.xlane.f32.xlu1 %v1246_v37 }
 0x490   :  { %v1248_v38 = vpop.eup %1247 }
 0x491   :  { %876 = vadd.xlane.f32.xlu0 %v1248_v38 }
 0x492   :  { %v1250_v39 = vpop.eup %1249 }
 0x493   :  { %878 = vadd.xlane.f32.xlu1 %v1250_v39 }
 0x494   :  { %v1252_v40 = vpop.eup %1251 }
 0x495   :  { %884 = vadd.xlane.f32.xlu0 %v1252_v40 }
 0x498   :  { %v1254_v41 = vpop.eup %1253 }
 0x499   :  { %v1256_v42 = vpop.eup %1255  ;;  %886 = vadd.xlane.f32.xlu1 %v1254_v41 }
 0x49a   :  { %888 = vadd.xlane.f32.xlu0 %v1256_v42 }
 0x49c   :  { %v1258_v43 = vpop.eup %1257 }
 0x49d   :  { %890 = vadd.xlane.f32.xlu1 %v1258_v43 }
 0x504   :  { %v865_v44 = vpop.xlane.xlu0 %864 }
 0x505   :  { %1259 = vlog2.f32 %v865_v44 }
 0x508   :  { %v867_v53 = vpop.xlane.xlu1 %866  ;;  %v861_v54 = vpop.xlane.xlu0 %860 }
 0x509   :  { %1261 = vlog2.f32 %v867_v53 }
 0x50a   :  { %1263 = vlog2.f32 %v861_v54 }
 0x50c   :  { %v863_v56 = vpop.xlane.xlu1 %862 }
 0x50d   :  { %1265 = vlog2.f32 %v863_v56 }
 0x50e   :  { %v873_v57 = vpop.xlane.xlu0 %872 }
 0x50f   :  { %1267 = vlog2.f32 %v873_v57 }
 0x510   :  { %v875_v59 = vpop.xlane.xlu1 %874 }
 0x511   :  { %1269 = vlog2.f32 %v875_v59 }
 0x512   :  { %v1260_v60 = vpop.eup %1259  ;;  %v869_v62 = vpop.xlane.xlu0 %868 }
 0x513   :  { %v897_v63 = vmul.f32 0.6931472, %v1260_v60  ;;  %1271 = vlog2.f32 %v869_v62 }
 0x514   :  { %v871_v1 = vpop.xlane.xlu1 %870 }
 0x515   :  { %v926_v2 = vsub.f32 %v1533_v45, %v897_v63  ;;  %1273 = vlog2.f32 %v871_v1 }
 0x516   :  { %v1262_v47 = vpop.eup %1261  ;;  %v881_v48 = vpop.xlane.xlu0 %880 }
 0x517   :  { %v1264_v49 = vpop.eup %1263  ;;  %942 = vst [vmem:[%s1657_s6 + $0x10] sm:$0xff] %v926_v2  ;;  %v899_v50 = vmul.f32 0.6931472, %v1262_v47  ;;  %1275 = vlog2.f32 %v881_v48 }
 0x518   :  { %v893_v52 = vmul.f32 0.6931472, %v1264_v49  ;;  %v883_v4 = vpop.xlane.xlu1 %882 }
 0x519   :  { %v927_v5 = vsub.f32 %v1539_v58, %v899_v50  ;;  %1277 = vlog2.f32 %v883_v4 }
 0x51a   :  { %v1266_v7 = vpop.eup %1265  ;;  %v924_v8 = vsub.f32 %v1536_v55, %v893_v52  ;;  %v877_v9 = vpop.xlane.xlu0 %876 }
 0x51b   :  { %943 = vst [vmem:[%s1657_s6 + $0x18] sm:$0xff] %v927_v5  ;;  %v895_v45 = vmul.f32 0.6931472, %v1266_v7  ;;  %1279 = vlog2.f32 %v877_v9 }
 0x51c   :  { %v1268_v11 = vpop.eup %1267  ;;  %940 = vst [vmem:[%s1657_s6] sm:$0xff] %v924_v8  ;;  %v879_v12 = vpop.xlane.xlu1 %878 }
 0x51d   :  { %v925_v13 = vsub.f32 %v1542_v61, %v895_v45  ;;  %v905_v58 = vmul.f32 0.6931472, %v1268_v11  ;;  %1281 = vlog2.f32 %v879_v12 }
 0x51e   :  { %v1270_v15 = vpop.eup %1269  ;;  %v885_v16 = vpop.xlane.xlu0 %884 }
 0x51f   :  { %941 = vst [vmem:[%s1657_s6 + $0x8] sm:$0xff] %v925_v13  ;;  %v930_v55 = vsub.f32 %v1545_v0, %v905_v58  ;;  %v907_v18 = vmul.f32 0.6931472, %v1270_v15  ;;  %1283 = vlog2.f32 %v885_v16 }
 0x520   :  { %v1272_v19 = vpop.eup %1271 }
 0x521   :  { %946 = vst [vmem:[%s1657_s6 + $0x30] sm:$0xff] %v930_v55  ;;  %v931_v20 = vsub.f32 %v1548_v46, %v907_v18  ;;  %v901_v61 = vmul.f32 0.6931472, %v1272_v19 }
 0x522   :  { %v1274_v22 = vpop.eup %1273  ;;  %v887_v23 = vpop.xlane.xlu1 %886 }
 0x523   :  { %947 = vst [vmem:[%s1657_s6 + $0x38] sm:$0xff] %v931_v20  ;;  %v928_v24 = vsub.f32 %v1551_v3, %v901_v61  ;;  %v903_v25 = vmul.f32 0.6931472, %v1274_v22  ;;  %1285 = vlog2.f32 %v887_v23  ;;  %v889_v0 = vpop.xlane.xlu0 %888 }
 0x524   :  { %v1276_v26 = vpop.eup %1275  ;;  %1287 = vlog2.f32 %v889_v0 }
 0x525   :  { %944 = vst [vmem:[%s1657_s6 + $0x20] sm:$0xff] %v928_v24  ;;  %v929_v46 = vsub.f32 %v1554_v51, %v903_v25  ;;  %v913_v29 = vmul.f32 0.6931472, %v1276_v26 }
 0x526   :  { %v1278_v30 = vpop.eup %1277  ;;  %v891_v31 = vpop.xlane.xlu1 %890 }
 0x527   :  { %945 = vst [vmem:[%s1657_s6 + $0x28] sm:$0xff] %v929_v46  ;;  %v934_v3 = vsub.f32 %v1557_v6, %v913_v29  ;;  %v915_v32 = vmul.f32 0.6931472, %v1278_v30  ;;  %1289 = vlog2.f32 %v891_v31 }
 0x528   :  { %v1280_v33 = vpop.eup %1279 }
 0x529   :  { %950 = vst [vmem:[%s1657_s6 + $0x50] sm:$0xff] %v934_v3  ;;  %v935_v35 = vsub.f32 %v1560_v10, %v915_v32  ;;  %v909_v36 = vmul.f32 0.6931472, %v1280_v33 }
 0x52a   :  { %v1282_v51 = vpop.eup %1281 }
 0x52b   :  { %951 = vst [vmem:[%s1657_s6 + $0x58] sm:$0xff] %v935_v35  ;;  %v932_v37 = vsub.f32 %v1564_v14, %v909_v36  ;;  %v911_v38 = vmul.f32 0.6931472, %v1282_v51 }
 0x52c   :  { %v1284_v39 = vpop.eup %1283 }
 0x52d   :  { %948 = vst [vmem:[%s1657_s6 + $0x40] sm:$0xff] %v932_v37  ;;  %v933_v6 = vsub.f32 %v1568_v17, %v911_v38  ;;  %v917_v40 = vmul.f32 0.6931472, %v1284_v39 }
 0x52f   :  { %949 = vst [vmem:[%s1657_s6 + $0x48] sm:$0xff] %v933_v6  ;;  %v936_v10 = vsub.f32 %v1572_v21, %v917_v40 }
 0x530   :  { %v1286_v41 = vpop.eup %1285 }
 0x531   :  { %v1288_v42 = vpop.eup %1287  ;;  %952 = vst [vmem:[%s1657_s6 + $0x60] sm:$0xff] %v936_v10  ;;  %v919_v14 = vmul.f32 0.6931472, %v1286_v41 }
 0x532   :  { %v921_v43 = vmul.f32 0.6931472, %v1288_v42 }
 0x533   :  { %v937_v44 = vsub.f32 %v1576_v27, %v919_v14 }
 0x534   :  { %v1290_v53 = vpop.eup %1289  ;;  %v938_v17 = vsub.f32 %v1579_v28, %v921_v43 }
 0x535   :  { %953 = vst [vmem:[%s1657_s6 + $0x68] sm:$0xff] %v937_v44  ;;  %v923_v54 = vmul.f32 0.6931472, %v1290_v53 }
 0x536   :  { %954 = vst [vmem:[%s1657_s6 + $0x70] sm:$0xff] %v938_v17 }
 0x537   :  { %v939_v21 = vsub.f32 %v1584_v34, %v923_v54 }
 0x539   :  { %955 = vst [vmem:[%s1657_s6 + $0x78] sm:$0xff] %v939_v21 }
 0x53a   :  { %960 = vsyncpa [#allocation3], 1 }
 0x53b   :  { %961 = vsyncpa [#allocation5], 1 }
 0x53c   :  { %962 = vsyncpa [#allocation8], 1 }

</bundles_post_ra>
